<compile_context>
chip_gen: v7x
topology: tpu7x:2x2x1
jax: 0.10.0
libtpu: 0.0.40
codegen_flags: <defaults>
</compile_context>

<pallas_src>
import jax
import jax.numpy as jnp
from jax.experimental import pallas as pl
from jax.experimental.pallas import tpu as pltpu

# ---- model dims (from FANN_NET) -------------------------------------------
D_IN, D_H1, D_H2, D_H3, D_OUT = 76, 300, 200, 100, 10


def _pad_to(n, m):
    return ((n + m - 1) // m) * m


# padded (lane-aligned) feature dims for the hidden/output layers
P_H1 = _pad_to(D_H1, 128)    # 384
P_H2 = _pad_to(D_H2, 128)    # 256
P_H3 = _pad_to(D_H3, 128)    # 128
P_OUT = _pad_to(D_OUT, 128)  # 128

TB_MAX = 2048  # batch tile (rows); sized for v7x's 64 MiB VMEM with headroom
NEG_BIG = jnp.float32(-1e30)


def fann_kernel(x_ref, w1_ref, b1_ref, w2_ref, b2_ref,
                w3_ref, b3_ref, w4_ref, b4_ref, o_ref):
    # x tile: (TB, 76) f32 -> bf16 for the MXU.
    x = x_ref[...].astype(jnp.bfloat16)

    h = jnp.dot(x, w1_ref[...], preferred_element_type=jnp.float32) + b1_ref[...]
    h = jnp.maximum(h, 0.0).astype(jnp.bfloat16)          # relu1 (f32), cast for MXU

    h = jnp.dot(h, w2_ref[...], preferred_element_type=jnp.float32) + b2_ref[...]
    h = jnp.maximum(h, 0.0).astype(jnp.bfloat16)          # relu2

    h = jnp.dot(h, w3_ref[...], preferred_element_type=jnp.float32) + b3_ref[...]
    h = jnp.maximum(h, 0.0).astype(jnp.bfloat16)          # relu3

    # class mask is baked into b4 (pad lanes = -1e30), so no iota/where needed.
    logits = jnp.dot(h, w4_ref[...], preferred_element_type=jnp.float32) + b4_ref[...]

    m = jnp.max(logits, axis=-1, keepdims=True)
    z = logits - m
    lse = jnp.log(jnp.sum(jnp.exp(z), axis=-1, keepdims=True))
    o_ref[...] = z - lse


def prepare_params(params):
    """One-time prep: pad output dims to 128-lane multiples, cast weights to
    bf16, keep biases f32, bake the 10-class mask into the fc4 bias."""
    w1, b1, w2, b2, w3, b3, w4, b4 = params

    def padw(w, rows, cols):
        w = w.astype(jnp.bfloat16)
        return jnp.pad(w, ((0, rows - w.shape[0]), (0, cols - w.shape[1])))

    def padb(b, cols, fill=0.0):
        out = jnp.full((1, cols), fill, jnp.float32)
        return out.at[0, : b.shape[0]].set(b.astype(jnp.float32))

    w1p = padw(w1, D_IN, P_H1)          # input dim stays 76 (K handled in-kernel)
    w2p = padw(w2, P_H1, P_H2)
    w3p = padw(w3, P_H2, P_H3)
    w4p = padw(w4, P_H3, P_OUT)
    b1p = padb(b1, P_H1)
    b2p = padb(b2, P_H2)
    b3p = padb(b3, P_H3)
    b4p = padb(b4, P_OUT, fill=NEG_BIG)  # mask padded classes via the bias
    return tuple(jax.device_put(p) for p in
                 (w1p, b1p, w2p, b2p, w3p, b3p, w4p, b4p))


@jax.jit
def fann_net_forward(x, prepared):
    """x: [B, 76] float32.  prepared: output of prepare_params.
    Returns log-probs [B, 10] (float32)."""
    w1p, b1p, w2p, b2p, w3p, b3p, w4p, b4p = prepared

    B = x.shape[0]
    Bp = _pad_to(B, 8)
    xp = x.astype(jnp.float32)
    if Bp != B:                           # batch-only pad (rare, tiny)
        xp = jnp.pad(xp, ((0, Bp - B), (0, 0)))

    TB = min(TB_MAX, Bp)                  # multiple of 8 by construction
    grid = (pl.cdiv(Bp, TB),)

    operands = (xp, w1p, b1p, w2p, b2p, w3p, b3p, w4p, b4p)

    # x streams per grid step; weights/biases are resident (constant index_map).
    in_specs = [pl.BlockSpec((TB, D_IN), lambda i: (i, 0))]
    in_specs += [pl.BlockSpec(op.shape, lambda i: (0, 0)) for op in operands[1:]]
    out_spec = pl.BlockSpec((TB, P_OUT), lambda i: (i, 0))

    weight_bytes = sum(int(p.size) * p.dtype.itemsize for p in prepared)
    cost = pl.CostEstimate(
        flops=2 * Bp * (D_IN * P_H1 + P_H1 * P_H2 + P_H2 * P_H3 + P_H3 * P_OUT),
        transcendentals=Bp * (P_OUT + 1),
        bytes_accessed=Bp * D_IN * 4 + Bp * P_OUT * 4 + weight_bytes,
    )

    out = pl.pallas_call(
        fann_kernel,
        out_shape=jax.ShapeDtypeStruct((Bp, P_OUT), jnp.float32),
        grid_spec=pl.GridSpec(
            grid=grid,
            in_specs=in_specs,
            out_specs=out_spec,
        ),
        compiler_params=pltpu.CompilerParams(
            dimension_semantics=("parallel",),       # megacore sharding on v7x
            vmem_limit_bytes=64 * 1024 * 1024,       # lift v5e's small default
        ),
        cost_estimate=cost,
    )(*operands)

    return out[:B, :D_OUT]


def init_params(key):
    """Deterministic init matching nn.Linear default: U(-1/sqrt(fan_in), +).
    Weights stored as [in_features, out_features]."""
    dims = [(D_IN, D_H1), (D_H1, D_H2), (D_H2, D_H3), (D_H3, D_OUT)]
    params = []
    for fan_in, fan_out in dims:
        key, kw, kb = jax.random.split(key, 3)
        bound = 1.0 / jnp.sqrt(fan_in)
        w = jax.random.uniform(kw, (fan_in, fan_out), jnp.float32, -bound, bound)
        b = jax.random.uniform(kb, (fan_out,), jnp.float32, -bound, bound)
        params += [w, b]
    return tuple(params)


def reference_forward_f32(x, params):
    w1, b1, w2, b2, w3, b3, w4, b4 = params
    h = jnp.maximum(x @ w1 + b1, 0.0)
    h = jnp.maximum(h @ w2 + b2, 0.0)
    h = jnp.maximum(h @ w3 + b3, 0.0)
    return jax.nn.log_softmax(h @ w4 + b4, axis=1)


def reference_forward_bf16(x, params):
    """Matches the kernel's numerics: bf16 matmul operands, f32 accumulation."""
    w1, b1, w2, b2, w3, b3, w4, b4 = params

    def mm(a, w):
        return jnp.dot(a.astype(jnp.bfloat16), w.astype(jnp.bfloat16),
                       preferred_element_type=jnp.float32)

    h = jnp.maximum(mm(x, w1) + b1, 0.0)
    h = jnp.maximum(mm(h, w2) + b2, 0.0)
    h = jnp.maximum(mm(h, w3) + b3, 0.0)
    return jax.nn.log_softmax(mm(h, w4) + b4, axis=1)


if __name__ == "__main__":
    key = jax.random.PRNGKey(0)
    kp, kx = jax.random.split(key)
    params = init_params(kp)
    prepared = prepare_params(params)

    B = 8
    x = jax.random.normal(kx, (B, D_IN), jnp.float32)

    out = fann_net_forward(x, prepared)
    out = jax.block_until_ready(out)
    assert out.shape == (B, D_OUT)

    ref_bf16 = reference_forward_bf16(x, params)
    ref_f32 = reference_forward_f32(x, params)
    assert jnp.allclose(out, ref_bf16, atol=2e-3, rtol=2e-3), \
        "mismatch vs bf16-matched reference"
    assert jnp.allclose(out, ref_f32, atol=1.5e-1, rtol=1.5e-1), \
        "mismatch vs f32 reference (sanity)"

    print("KERNEL_OK")
</pallas_src>

<mosaic_0001>
module attributes {stable_mosaic.version = 11 : i64} {
  func.func @fann_kernel(%arg0: i32, %arg1: memref<8x76xf32, #tpu.memory_space<vmem>>, %arg2: memref<76x384xbf16, #tpu.memory_space<vmem>>, %arg3: memref<1x384xf32, #tpu.memory_space<vmem>>, %arg4: memref<384x256xbf16, #tpu.memory_space<vmem>>, %arg5: memref<1x256xf32, #tpu.memory_space<vmem>>, %arg6: memref<256x128xbf16, #tpu.memory_space<vmem>>, %arg7: memref<1x128xf32, #tpu.memory_space<vmem>>, %arg8: memref<128x128xbf16, #tpu.memory_space<vmem>>, %arg9: memref<1x128xf32, #tpu.memory_space<vmem>>, %arg10: memref<8x128xf32, #tpu.memory_space<vmem>>) attributes {dimension_semantics = [#tpu.dimension_semantics<parallel>], iteration_bounds = array<i64: 1>, scalar_prefetch = 0 : i64, scratch_operands = 0 : i64, tpu.core_type = #tpu.core_type<tc>, window_params = [{transform_indices = @transform_0, window_bounds = array<i64: 8, 76>}, {pipeline_mode = #tpu.pipeline_mode<synchronous>, transform_indices = @transform_1, window_bounds = array<i64: 76, 384>}, {pipeline_mode = #tpu.pipeline_mode<synchronous>, transform_indices = @transform_2, window_bounds = array<i64: 1, 384>}, {pipeline_mode = #tpu.pipeline_mode<synchronous>, transform_indices = @transform_3, window_bounds = array<i64: 384, 256>}, {pipeline_mode = #tpu.pipeline_mode<synchronous>, transform_indices = @transform_4, window_bounds = array<i64: 1, 256>}, {pipeline_mode = #tpu.pipeline_mode<synchronous>, transform_indices = @transform_5, window_bounds = array<i64: 256, 128>}, {pipeline_mode = #tpu.pipeline_mode<synchronous>, transform_indices = @transform_6, window_bounds = array<i64: 1, 128>}, {pipeline_mode = #tpu.pipeline_mode<synchronous>, transform_indices = @transform_7, window_bounds = array<i64: 128, 128>}, {pipeline_mode = #tpu.pipeline_mode<synchronous>, transform_indices = @transform_8, window_bounds = array<i64: 1, 128>}, {transform_indices = @transform_9, window_bounds = array<i64: 8, 128>}]} {
    %c0 = arith.constant 0 : index
    %c0_0 = arith.constant 0 : index
    %0 = vector.load %arg1[%c0, %c0_0] : memref<8x76xf32, #tpu.memory_space<vmem>>, vector<8x76xf32>
    %1 = arith.truncf %0 : vector<8x76xf32> to vector<8x76xbf16>
    %c0_1 = arith.constant 0 : index
    %c0_2 = arith.constant 0 : index
    %2 = vector.load %arg2[%c0_1, %c0_2] : memref<76x384xbf16, #tpu.memory_space<vmem>>, vector<76x384xbf16>
    %cst = arith.constant dense<0.000000e+00> : vector<8x384xf32>
    %3 = tpu.matmul %1, %2, %cst {dimension_numbers = #tpu.dot_dimension_numbers<[1], [0], [0], [1], [0, 0, 1, 1], [], []>} : vector<8x76xbf16>, vector<76x384xbf16>, vector<8x384xf32> -> vector<8x384xf32>
    %c0_3 = arith.constant 0 : index
    %c0_4 = arith.constant 0 : index
    %4 = vector.load %arg3[%c0_3, %c0_4] : memref<1x384xf32, #tpu.memory_space<vmem>>, vector<1x384xf32>
    %5 = vector.broadcast %4 : vector<1x384xf32> to vector<8x384xf32>
    %6 = arith.addf %3, %5 : vector<8x384xf32>
    %cst_5 = arith.constant 0.000000e+00 : f32
    %7 = vector.broadcast %cst_5 : f32 to vector<8x384xf32>
    %8 = arith.maximumf %6, %7 : vector<8x384xf32>
    %9 = arith.truncf %8 : vector<8x384xf32> to vector<8x384xbf16>
    %c0_6 = arith.constant 0 : index
    %c0_7 = arith.constant 0 : index
    %10 = vector.load %arg4[%c0_6, %c0_7] : memref<384x256xbf16, #tpu.memory_space<vmem>>, vector<384x256xbf16>
    %cst_8 = arith.constant dense<0.000000e+00> : vector<8x256xf32>
    %11 = tpu.matmul %9, %10, %cst_8 {dimension_numbers = #tpu.dot_dimension_numbers<[1], [0], [0], [1], [0, 0, 1, 1], [], []>} : vector<8x384xbf16>, vector<384x256xbf16>, vector<8x256xf32> -> vector<8x256xf32>
    %c0_9 = arith.constant 0 : index
    %c0_10 = arith.constant 0 : index
    %12 = vector.load %arg5[%c0_9, %c0_10] : memref<1x256xf32, #tpu.memory_space<vmem>>, vector<1x256xf32>
    %13 = vector.broadcast %12 : vector<1x256xf32> to vector<8x256xf32>
    %14 = arith.addf %11, %13 : vector<8x256xf32>
    %cst_11 = arith.constant 0.000000e+00 : f32
    %15 = vector.broadcast %cst_11 : f32 to vector<8x256xf32>
    %16 = arith.maximumf %14, %15 : vector<8x256xf32>
    %17 = arith.truncf %16 : vector<8x256xf32> to vector<8x256xbf16>
    %c0_12 = arith.constant 0 : index
    %c0_13 = arith.constant 0 : index
    %18 = vector.load %arg6[%c0_12, %c0_13] : memref<256x128xbf16, #tpu.memory_space<vmem>>, vector<256x128xbf16>
    %cst_14 = arith.constant dense<0.000000e+00> : vector<8x128xf32>
    %19 = tpu.matmul %17, %18, %cst_14 {dimension_numbers = #tpu.dot_dimension_numbers<[1], [0], [0], [1], [0, 0, 1, 1], [], []>} : vector<8x256xbf16>, vector<256x128xbf16>, vector<8x128xf32> -> vector<8x128xf32>
    %c0_15 = arith.constant 0 : index
    %c0_16 = arith.constant 0 : index
    %20 = vector.load %arg7[%c0_15, %c0_16] : memref<1x128xf32, #tpu.memory_space<vmem>>, vector<1x128xf32>
    %21 = vector.broadcast %20 : vector<1x128xf32> to vector<8x128xf32>
    %22 = arith.addf %19, %21 : vector<8x128xf32>
    %cst_17 = arith.constant 0.000000e+00 : f32
    %23 = vector.broadcast %cst_17 : f32 to vector<8x128xf32>
    %24 = arith.maximumf %22, %23 : vector<8x128xf32>
    %25 = arith.truncf %24 : vector<8x128xf32> to vector<8x128xbf16>
    %c0_18 = arith.constant 0 : index
    %c0_19 = arith.constant 0 : index
    %26 = vector.load %arg8[%c0_18, %c0_19] : memref<128x128xbf16, #tpu.memory_space<vmem>>, vector<128x128xbf16>
    %cst_20 = arith.constant dense<0.000000e+00> : vector<8x128xf32>
    %27 = tpu.matmul %25, %26, %cst_20 {dimension_numbers = #tpu.dot_dimension_numbers<[1], [0], [0], [1], [0, 0, 1, 1], [], []>} : vector<8x128xbf16>, vector<128x128xbf16>, vector<8x128xf32> -> vector<8x128xf32>
    %c0_21 = arith.constant 0 : index
    %c0_22 = arith.constant 0 : index
    %28 = vector.load %arg9[%c0_21, %c0_22] : memref<1x128xf32, #tpu.memory_space<vmem>>, vector<1x128xf32>
    %29 = vector.broadcast %28 : vector<1x128xf32> to vector<8x128xf32>
    %30 = arith.addf %27, %29 : vector<8x128xf32>
    %cst_23 = arith.constant dense<0xFF800000> : vector<8xf32>
    %31 = vector.multi_reduction <maximumf>, %30, %cst_23 [1] : vector<8x128xf32> to vector<8xf32>
    %32 = vector.shape_cast %31 : vector<8xf32> to vector<8x1xf32>
    %33 = vector.broadcast %32 : vector<8x1xf32> to vector<8x128xf32>
    %34 = arith.subf %30, %33 : vector<8x128xf32>
    %35 = math.exp %34 : vector<8x128xf32>
    %cst_24 = arith.constant dense<0.000000e+00> : vector<8xf32>
    %36 = vector.multi_reduction <add>, %35, %cst_24 [1] : vector<8x128xf32> to vector<8xf32>
    %37 = vector.shape_cast %36 : vector<8xf32> to vector<8x1xf32>
    %38 = math.log %37 : vector<8x1xf32>
    %39 = vector.broadcast %38 : vector<8x1xf32> to vector<8x128xf32>
    %40 = arith.subf %34, %39 : vector<8x128xf32>
    %c0_25 = arith.constant 0 : index
    %c0_26 = arith.constant 0 : index
    %41 = vector.load %arg10[%c0_25, %c0_26] : memref<8x128xf32, #tpu.memory_space<vmem>>, vector<8x128xf32>
    tpu.vector_store %arg10[%c0_25, %c0_26], %40 {strides = array<i32>} : memref<8x128xf32, #tpu.memory_space<vmem>>, vector<8x128xf32>,
    return
  }
  func.func @transform_0(%arg0: i32) -> (i32, i32) {
    %c0_i32 = arith.constant 0 : i32
    %c0_i32_0 = arith.constant 0 : i32
    return %arg0, %c0_i32 : i32, i32
  }
  func.func @transform_1(%arg0: i32) -> (i32, i32) {
    %c0_i32 = arith.constant 0 : i32
    %c0_i32_0 = arith.constant 0 : i32
    %c0_i32_1 = arith.constant 0 : i32
    return %c0_i32, %c0_i32_0 : i32, i32
  }
  func.func @transform_2(%arg0: i32) -> (i32, i32) {
    %c0_i32 = arith.constant 0 : i32
    %c0_i32_0 = arith.constant 0 : i32
    %c0_i32_1 = arith.constant 0 : i32
    return %c0_i32, %c0_i32_0 : i32, i32
  }
  func.func @transform_3(%arg0: i32) -> (i32, i32) {
    %c0_i32 = arith.constant 0 : i32
    %c0_i32_0 = arith.constant 0 : i32
    %c0_i32_1 = arith.constant 0 : i32
    return %c0_i32, %c0_i32_0 : i32, i32
  }
  func.func @transform_4(%arg0: i32) -> (i32, i32) {
    %c0_i32 = arith.constant 0 : i32
    %c0_i32_0 = arith.constant 0 : i32
    %c0_i32_1 = arith.constant 0 : i32
    return %c0_i32, %c0_i32_0 : i32, i32
  }
  func.func @transform_5(%arg0: i32) -> (i32, i32) {
    %c0_i32 = arith.constant 0 : i32
    %c0_i32_0 = arith.constant 0 : i32
    %c0_i32_1 = arith.constant 0 : i32
    return %c0_i32, %c0_i32_0 : i32, i32
  }
  func.func @transform_6(%arg0: i32) -> (i32, i32) {
    %c0_i32 = arith.constant 0 : i32
    %c0_i32_0 = arith.constant 0 : i32
    %c0_i32_1 = arith.constant 0 : i32
    return %c0_i32, %c0_i32_0 : i32, i32
  }
  func.func @transform_7(%arg0: i32) -> (i32, i32) {
    %c0_i32 = arith.constant 0 : i32
    %c0_i32_0 = arith.constant 0 : i32
    %c0_i32_1 = arith.constant 0 : i32
    return %c0_i32, %c0_i32_0 : i32, i32
  }
  func.func @transform_8(%arg0: i32) -> (i32, i32) {
    %c0_i32 = arith.constant 0 : i32
    %c0_i32_0 = arith.constant 0 : i32
    %c0_i32_1 = arith.constant 0 : i32
    return %c0_i32, %c0_i32_0 : i32, i32
  }
  func.func @transform_9(%arg0: i32) -> (i32, i32) {
    %c0_i32 = arith.constant 0 : i32
    %c0_i32_0 = arith.constant 0 : i32
    return %arg0, %c0_i32 : i32, i32
  }
}

</mosaic_0001>

<bundles_post_ra>
// kernel: fann_net_forward.1
= control target key start
LH: loop header
LB: loop body
LE: loop exit
PB: predicated region body
PF: predicated region fallthrough
CT: control target
= control target key end

     0   :  { %14 = vsyncpa [#allocation3], 0  ;;  %s1833_s0 = inlined_call_operand.hbm [shape: f32[8,76], index: 0, kind: input, shape index: {}]   ;;  %s1834_s1 = inlined_call_operand.hbm [shape: bf16[76,384], index: 1, kind: input, shape index: {}]   ;;  %s1835_s2 = inlined_call_operand.hbm [shape: f32[1,384], index: 2, kind: input, shape index: {}]   ;;  %s1836_s3 = inlined_call_operand.hbm [shape: bf16[384,256], index: 3, kind: input, shape index: {}]   ;;  %s1837_s4 = inlined_call_operand.hbm [shape: f32[1,256], index: 4, kind: input, shape index: {}]   ;;  %s1838_s5 = inlined_call_operand.hbm [shape: bf16[256,128], index: 5, kind: input, shape index: {}]   ;;  %s1839_s6 = inlined_call_operand.hbm [shape: f32[1,128], index: 6, kind: input, shape index: {}]   ;;  %s1840_s7 = inlined_call_operand.hbm [shape: bf16[128,128], index: 7, kind: input, shape index: {}]   ;;  %s1841_s8 = inlined_call_operand.hbm [shape: f32[1,128], index: 8, kind: input, shape index: {}]   ;;  %s1842_s9 = inlined_call_operand.hbm [shape: f32[8,128], index: 9, kind: output, shape index: {}]  }
   0x1   :  { %15 = vsyncpa [#allocation6], 0 }
   0x2   :  { %16 = vsyncpa [#allocation9], 0 }
   0x3   :  { %17 = vsyncpa [#allocation12], 0 }
   0x4   :  { %18 = vsyncpa [#allocation15], 0 }
   0x5   :  { %19 = vsyncpa [#allocation4], 0  ;;  %s1607_s30 = smov [#allocation5]   ;;  %s1375_s13 = scalar_lea.hbm %s1834_s1, 1920 }
   0x6   :  { %s35_s10 = sshll.u32 %s1607_s30, 4  ;;  %p1376_p0 = scmp.ne.s32.totalorder %s1834_s1, %s1375_s13  ;;  %s36_s10 = int_to_ptr.vmem [resolvable:$true] %s35_s10 }
   0x7   :  { %p1379_p1 = scmp.lt.u32.totalorder %s1375_s13, %s1834_s1 }
   0x9   :  { %p1381_p2 = pnand %p1379_p1, %p1376_p0 }
   0xb   :  { %1384 = shalt.err (!%p1381_p2)
}
   0xc   :  { %s1385_s18 = scalar_lea.vmem %s36_s10, 1920  ;;  %p1390_p4 = scmp.lt.s32.totalorder %s36_s10, %s36_s10 }
   0xd   :  { %p1386_p3 = scmp.ne.s32.totalorder %s36_s10, %s1385_s18  ;;  %p1391_p5 = scmp.lt.s32.totalorder %s1385_s18, %s1385_s18 }
   0xf   :  { %p1392_p6 = por %p1391_p5, %p1390_p4 }
  0x11   :  { %p1393_p7 = pnand %p1392_p6, %p1386_p3 }
  0x13   :  { %1396 = shalt.err (!%p1393_p7)
}
  0x14   :  { %s1608_s19 = smov 192   ;;  %s1609_s20 = smov 12  }
  0x15   :  { %41 = dma.hbm_to_vmem [thread:$0]  %s1834_s1, 1920, %s36_s10, [#allocation6], %s1608_s19, %s1608_s19, %s1609_s20  }
  0x16   :  { %s1610_s23 = smov [#allocation8]   ;;  %s1397_s27 = scalar_lea.hbm %s1836_s3, 6144 }
  0x17   :  { %s57_s24 = sshll.u32 %s1610_s23, 4  ;;  %p1398_p8 = scmp.ne.s32.totalorder %s1836_s3, %s1397_s27  ;;  %s58_s24 = int_to_ptr.vmem [resolvable:$true] %s57_s24 }
  0x18   :  { %p1401_p9 = scmp.lt.u32.totalorder %s1397_s27, %s1836_s3 }
  0x1a   :  { %p1403_p10 = pnand %p1401_p9, %p1398_p8 }
  0x1c   :  { %1406 = shalt.err (!%p1403_p10)
}
  0x1d   :  { %s1407_s12 = scalar_lea.vmem %s58_s24, 6144  ;;  %p1412_p12 = scmp.lt.s32.totalorder %s58_s24, %s58_s24 }
  0x1e   :  { %p1408_p11 = scmp.ne.s32.totalorder %s58_s24, %s1407_s12  ;;  %p1413_p13 = scmp.lt.s32.totalorder %s1407_s12, %s1407_s12 }
  0x20   :  { %p1414_p0 = por %p1413_p13, %p1412_p12 }
  0x22   :  { %p1415_p1 = pnand %p1414_p0, %p1408_p11 }
  0x24   :  { %1418 = shalt.err (!%p1415_p1)
}
  0x25   :  { %s1611_s1 = smov 128   ;;  %s1612_s10 = smov 8  }
  0x26   :  { %63 = dma.hbm_to_vmem [thread:$0]  %s1836_s3, 6144, %s58_s24, [#allocation9], %s1611_s1, %s1611_s1, %s1612_s10  }
  0x27   :  { %s1613_s15 = smov [#allocation11]   ;;  %s1419_s19 = scalar_lea.hbm %s1838_s5, 2048 }
  0x28   :  { %s79_s16 = sshll.u32 %s1613_s15, 4  ;;  %p1420_p2 = scmp.ne.s32.totalorder %s1838_s5, %s1419_s19  ;;  %s80_s16 = int_to_ptr.vmem [resolvable:$true] %s79_s16 }
  0x29   :  { %p1423_p3 = scmp.lt.u32.totalorder %s1419_s19, %s1838_s5 }
  0x2b   :  { %p1425_p4 = pnand %p1423_p3, %p1420_p2 }
  0x2d   :  { %1428 = shalt.err (!%p1425_p4)
}
  0x2e   :  { %s1429_s25 = scalar_lea.vmem %s80_s16, 2048  ;;  %p1434_p6 = scmp.lt.s32.totalorder %s80_s16, %s80_s16 }
  0x2f   :  { %p1430_p5 = scmp.ne.s32.totalorder %s80_s16, %s1429_s25  ;;  %p1435_p7 = scmp.lt.s32.totalorder %s1429_s25, %s1429_s25 }
  0x31   :  { %p1436_p8 = por %p1435_p7, %p1434_p6 }
  0x33   :  { %p1437_p9 = pnand %p1436_p8, %p1430_p5 }
  0x35   :  { %1440 = shalt.err (!%p1437_p9)
}
  0x36   :  { %s1614_s3 = smov 64   ;;  %s1615_s24 = smov 4  }
  0x37   :  { %85 = dma.hbm_to_vmem [thread:$0]  %s1838_s5, 2048, %s80_s16, [#allocation12], %s1614_s3, %s1614_s3, %s1615_s24  }
  0x38   :  { %s1616_s28 = smov [#allocation14]   ;;  %s1617_s30 = smov [#allocation2]  }
  0x39   :  { %s101_s29 = sshll.u32 %s1616_s28, 4  ;;  %s26_s11 = sshll.u32 %s1617_s30, 4  ;;  %s102_s29 = int_to_ptr.vmem [resolvable:$true] %s101_s29  ;;  %s27_s11 = int_to_ptr.vmem [resolvable:$true] %s26_s11 }
  0x3a   :  { %s1441_s10 = scalar_lea.hbm %s1840_s7, 1024 }
  0x3b   :  { %p1442_p10 = scmp.ne.s32.totalorder %s1840_s7, %s1441_s10  ;;  %p1445_p11 = scmp.lt.u32.totalorder %s1441_s10, %s1840_s7 }
  0x3d   :  { %p1447_p12 = pnand %p1445_p11, %p1442_p10 }
  0x3f   :  { %1450 = shalt.err (!%p1447_p12)
}
  0x40   :  { %s1451_s5 = scalar_lea.vmem %s102_s29, 1024  ;;  %p1456_p0 = scmp.lt.s32.totalorder %s102_s29, %s102_s29 }
  0x41   :  { %p1452_p13 = scmp.ne.s32.totalorder %s102_s29, %s1451_s5  ;;  %p1457_p1 = scmp.lt.s32.totalorder %s1451_s5, %s1451_s5 }
  0x43   :  { %p1458_p2 = por %p1457_p1, %p1456_p0 }
  0x45   :  { %p1459_p3 = pnand %p1458_p2, %p1452_p13 }
  0x47   :  { %1462 = shalt.err (!%p1459_p3)
}
  0x48   :  { %107 = dma.hbm_to_vmem [thread:$0]  %s1840_s7, 1024, %s102_s29, [#allocation15], %s1614_s3, %s1614_s3, %s1615_s24  }
  0x49   :  { %s1463_s21 = scalar_lea.hbm %s1833_s0, 128 }
  0x4a   :  { %p1464_p4 = scmp.ne.s32.totalorder %s1833_s0, %s1463_s21  ;;  %p1467_p5 = scmp.lt.u32.totalorder %s1463_s21, %s1833_s0 }
  0x4c   :  { %p1469_p6 = pnand %p1467_p5, %p1464_p4 }
  0x4e   :  { %1472 = shalt.err (!%p1469_p6)
}
  0x4f   :  { %s1473_s27 = scalar_lea.vmem %s27_s11, 128  ;;  %p1478_p8 = scmp.lt.s32.totalorder %s27_s11, %s27_s11 }
  0x50   :  { %p1474_p7 = scmp.ne.s32.totalorder %s27_s11, %s1473_s27  ;;  %p1479_p9 = scmp.lt.s32.totalorder %s1473_s27, %s1473_s27 }
  0x52   :  { %p1480_p10 = por %p1479_p9, %p1478_p8 }
  0x54   :  { %p1481_p11 = pnand %p1480_p10, %p1474_p7 }
  0x56   :  { %1484 = shalt.err (!%p1481_p11)
}
  0x57   :  { %29 = dma.hbm_to_vmem [thread:$0]  %s1833_s0, 128, %s27_s11, [#allocation3]  }
  0x58   :  { %s1618_s24 = smov [#allocation7]   ;;  %s1619_s29 = smov [#allocation10]  }
  0x59   :  { %s48_s28 = sshll.u32 %s1618_s24, 4  ;;  %s70_s30 = sshll.u32 %s1619_s29, 4  ;;  %s49_s28 = int_to_ptr.vmem [resolvable:$true] %s48_s28  ;;  %s71_s30 = int_to_ptr.vmem [resolvable:$true] %s70_s30 }
  0x5a   :  { %s1485_s10 = scalar_lea.hbm %s1835_s2, 48 }
  0x5b   :  { %p1486_p12 = scmp.ne.s32.totalorder %s1835_s2, %s1485_s10  ;;  %p1489_p13 = scmp.lt.u32.totalorder %s1485_s10, %s1835_s2 }
  0x5d   :  { %p1491_p0 = pnand %p1489_p13, %p1486_p12 }
  0x5f   :  { %1494 = shalt.err (!%p1491_p0)
}
  0x60   :  { %s1495_s0 = scalar_lea.vmem %s49_s28, 48  ;;  %s1499_s11 = scalar_lea.vmem %s49_s28, 64 }
  0x61   :  { %p1496_p1 = scmp.ne.s32.totalorder %s49_s28, %s1495_s0  ;;  %p1500_p2 = scmp.lt.s32.totalorder %s49_s28, %s49_s28 }
  0x62   :  { %p1501_p3 = scmp.lt.s32.totalorder %s1499_s11, %s1495_s0 }
  0x64   :  { %p1502_p4 = por %p1501_p3, %p1500_p2 }
  0x66   :  { %p1503_p5 = pnand %p1502_p4, %p1496_p1 }
  0x68   :  { %1506 = shalt.err (!%p1503_p5)
}
  0x69   :  { %51 = dma.hbm_to_vmem [thread:$0]  %s1835_s2, 48, %s49_s28, [#allocation6]  }
  0x6a   :  { %s1507_s20 = scalar_lea.hbm %s1837_s4, 32 }
  0x6b   :  { %p1508_p6 = scmp.ne.s32.totalorder %s1837_s4, %s1507_s20  ;;  %p1511_p7 = scmp.lt.u32.totalorder %s1507_s20, %s1837_s4 }
  0x6d   :  { %p1513_p8 = pnand %p1511_p7, %p1508_p6 }
  0x6f   :  { %1516 = shalt.err (!%p1513_p8)
}
  0x70   :  { %s1517_s26 = scalar_lea.vmem %s71_s30, 32  ;;  %p1522_p10 = scmp.lt.s32.totalorder %s71_s30, %s71_s30 }
  0x71   :  { %p1518_p9 = scmp.ne.s32.totalorder %s71_s30, %s1517_s26  ;;  %p1523_p11 = scmp.lt.s32.totalorder %s1517_s26, %s1517_s26 }
  0x73   :  { %p1524_p12 = por %p1523_p11, %p1522_p10 }
  0x75   :  { %p1525_p13 = pnand %p1524_p12, %p1518_p9 }
  0x77   :  { %1528 = shalt.err (!%p1525_p13)
}
  0x78   :  { %73 = dma.hbm_to_vmem [thread:$0]  %s1837_s4, 32, %s71_s30, [#allocation9]  }
  0x79   :  { %s1620_s7 = smov [#allocation13]   ;;  %s1621_s24 = smov [#allocation16]  }
  0x7a   :  { %s92_s3 = sshll.u32 %s1620_s7, 4  ;;  %s114_s28 = sshll.u32 %s1621_s24, 4  ;;  %s93_s3 = int_to_ptr.vmem [resolvable:$true] %s92_s3  ;;  %s115_s28 = int_to_ptr.vmem [resolvable:$true] %s114_s28 }
  0x7b   :  { %s1529_s1 = scalar_lea.hbm %s1839_s6, 16 }
  0x7c   :  { %p1530_p0 = scmp.ne.s32.totalorder %s1839_s6, %s1529_s1  ;;  %p1533_p1 = scmp.lt.u32.totalorder %s1529_s1, %s1839_s6 }
  0x7e   :  { %p1535_p2 = pnand %p1533_p1, %p1530_p0 }
  0x80   :  { %1538 = shalt.err (!%p1535_p2)
}
  0x81   :  { %s1539_s4 = scalar_lea.vmem %s93_s3, 16  ;;  %s1543_s30 = scalar_lea.vmem %s93_s3, 32 }
  0x82   :  { %p1540_p3 = scmp.ne.s32.totalorder %s93_s3, %s1539_s4  ;;  %p1544_p4 = scmp.lt.s32.totalorder %s93_s3, %s93_s3 }
  0x83   :  { %p1545_p5 = scmp.lt.s32.totalorder %s1543_s30, %s1539_s4 }
  0x85   :  { %p1546_p6 = por %p1545_p5, %p1544_p4 }
  0x87   :  { %p1547_p7 = pnand %p1546_p6, %p1540_p3 }
  0x89   :  { %1550 = shalt.err (!%p1547_p7)
}
  0x8a   :  { %95 = dma.hbm_to_vmem [thread:$0]  %s1839_s6, 16, %s93_s3, [#allocation12]  }
  0x8b   :  { %s1551_s16 = scalar_lea.hbm %s1841_s8, 16 }
  0x8c   :  { %p1552_p8 = scmp.ne.s32.totalorder %s1841_s8, %s1551_s16  ;;  %p1555_p9 = scmp.lt.u32.totalorder %s1551_s16, %s1841_s8 }
  0x8e   :  { %p1557_p10 = pnand %p1555_p9, %p1552_p8 }
  0x90   :  { %1560 = shalt.err (!%p1557_p10)
}
  0x91   :  { %s1561_s22 = scalar_lea.vmem %s115_s28, 16  ;;  %s1565_s23 = scalar_lea.vmem %s115_s28, 32 }
  0x92   :  { %p1562_p11 = scmp.ne.s32.totalorder %s115_s28, %s1561_s22  ;;  %p1566_p12 = scmp.lt.s32.totalorder %s115_s28, %s115_s28 }
  0x93   :  { %p1567_p13 = scmp.lt.s32.totalorder %s1565_s23, %s1561_s22 }
  0x95   :  { %p1568_p0 = por %p1567_p13, %p1566_p12 }
  0x97   :  { %p1569_p1 = pnand %p1568_p0, %p1562_p11 }
  0x99   :  { %1572 = shalt.err (!%p1569_p1)
}
  0x9a   :  { %117 = dma.hbm_to_vmem [thread:$0]  %s1841_s8, 16, %s115_s28, [#allocation15]  }
  0x9b   :  { %1595 = dma.done.wait [#allocation3], 128  }
  0x9c   :  { %1596 = vsyncadd [#allocation3], 4294967168 }
  0x9d   :  { %1597 = dma.done.wait [#allocation6], 1968  }
  0x9e   :  { %1598 = vsyncadd [#allocation6], 4294965328 }
  0x9f   :  { %1599 = dma.done.wait [#allocation9], 6176  }
  0xa0   :  { %1600 = vsyncadd [#allocation9], 4294961120 }
  0xa1   :  { %1601 = dma.done.wait [#allocation12], 2064  }
  0xa2   :  { %1602 = vsyncadd [#allocation12], 4294965232 }
  0xa3   :  { %1603 = dma.done.wait [#allocation15], 1040  }
  0xa4   :  { %1604 = vsyncadd [#allocation15], 4294966256  ;;  %v1622_v0 = vmov 0   ;;  %v1255_v1 = vld [vmem:[#allocation5 + $0x4] ss:$12 sps:$4 sm:$0xff]   ;;  %vm266_vm0 = vcmask 1045504  }
  0xa5   :  { %308 = vmatprep.mubr.bf16.mxu1 %v1622_v0  ;;  %v1257_v2 = vld [vmem:[#allocation5] ss:$12 sps:$4 sm:$0xff]   ;;  %276 = vmatprep.subr.bf16.mxu1 %v1255_v1  ;;  %v1258_v3 = vld [vmem:[#allocation5 + $0x1c] ss:$12 sps:$4 sm:$0xff]   ;;  %v1260_v4 = vld [vmem:[#allocation5 + $0x18] ss:$12 sps:$4 sm:$0xff]  }
  0xa6   :  { %277 = vmatpush1.bf16.msra.mxu1 %v1257_v2  ;;  %v1261_v5 = vld [vmem:[#allocation5 + $0x34] ss:$12 sps:$4 sm:$0xff]   ;;  %v1263_v6 = vld [vmem:[#allocation5 + $0x30] ss:$12 sps:$4 sm:$0xff]   ;;  %v1264_v7 = vld [vmem:[#allocation5 + $0x4c] ss:$12 sps:$4 sm:$0xff]  }
  0xa7   :  { %278 = vmatprep.subr.bf16.mxu1 %v1258_v3  ;;  %v1267_v8 = vld [vmem:[#allocation5 + $0x64] ss:$12 sps:$4 sm:$0x3f]   ;;  %v1266_v9 = vld [vmem:[#allocation5 + $0x48] ss:$12 sps:$4 sm:$0xff]   ;;  %v146_v14 = vld [vmem:[#allocation2] sm:$0xff]  ;;  %v170_v3 = vlaneseq }
  0xa8   :  { %v1269_v10 = vld [vmem:[#allocation5 + $0x60] ss:$12 sps:$4 sm:$0x3f]   ;;  %v1277_v12 = vld [vmem:[#allocation8] ss:$8 sps:$4 sm:$0xff]   ;;  %v147_v18 = vpack.c.bf16 %v146_v14, %v146_v14  ;;  %vm262_vm1 = vcmask 621568  }
  0xa9   :  { %v1275_v11 = vld [vmem:[#allocation8 + $0x4] ss:$8 sps:$4 sm:$0xff]   ;;  %v1278_v13 = vld [vmem:[#allocation8 + $0x14] ss:$8 sps:$4 sm:$0xff]   ;;  %v268_v15 = vsel %vm266_vm0, %v1269_v10, 0  ;;  %v1623_v20 = vmov 0.0  }
  0xaa   :  { %279 = vmatpush1.bf16.msra.mxu1 %v1260_v4  ;;  %663 = vmatprep.subr.bf16.mxu0 %v1275_v11  ;;  %v1280_v16 = vld [vmem:[#allocation8 + $0x10] ss:$8 sps:$4 sm:$0xff]   ;;  %v1281_v17 = vld [vmem:[#allocation8 + $0x24] ss:$8 sps:$4 sm:$0xff]   ;;  %v1283_v21 = vld [vmem:[#allocation8 + $0x20] ss:$8 sps:$4 sm:$0xff]  }
  0xab   :  { %280 = vmatprep.subr.bf16.mxu1 %v1261_v5  ;;  %664 = vmatpush1.bf16.msra.mxu0 %v1277_v12  ;;  %v1270_v19 = vld [vmem:[#allocation5 + $0x8] ss:$12 sps:$4 sm:$0xff]   ;;  %v1284_v22 = vld [vmem:[#allocation8 + $0x34] ss:$8 sps:$4 sm:$0xff]   ;;  %v1271_v23 = vld [vmem:[#allocation5 + $0x20] ss:$12 sps:$4 sm:$0xff]  }
  0xac   :  { %665 = vmatprep.subr.bf16.mxu0 %v1278_v13  ;;  %vm1624_vm2 = vmmov 0   ;;  %v1286_v24 = vld [vmem:[#allocation8 + $0x30] ss:$8 sps:$4 sm:$0xff]   ;;  %v1287_v25 = vld [vmem:[#allocation8 + $0x44] ss:$8 sps:$4 sm:$0xff]   ;;  %v1797_v4 = vshrl.u32 %v170_v3, 7 }
  0xad   :  { %v1272_v26 = vld [vmem:[#allocation5 + $0x38] ss:$12 sps:$4 sm:$0xff]   ;;  %v1273_v28 = vld [vmem:[#allocation5 + $0x50] ss:$12 sps:$4 sm:$0xff]   ;;  %v1292_v31 = vld [vmem:[#allocation8 + $0x50] ss:$8 sps:$4 sm:$0xff]  }
  0xae   :  { %281 = vmatpush1.bf16.msra.mxu1 %v1263_v6  ;;  %v1289_v27 = vld [vmem:[#allocation8 + $0x40] ss:$8 sps:$4 sm:$0xff]   ;;  %v1290_v29 = vld [vmem:[#allocation8 + $0x54] ss:$8 sps:$4 sm:$0xff]   ;;  %v1293_v32 = vld [vmem:[#allocation8 + $0x64] ss:$8 sps:$4 sm:$0xff]  }
  0xaf   :  { %282 = vmatprep.subr.bf16.mxu1 %v1264_v7  ;;  %666 = vmatpush1.bf16.msra.mxu0 %v1280_v16  ;;  %v1274_v30 = vld [vmem:[#allocation5 + $0x68] ss:$12 sps:$4 sm:$0x3f]   ;;  %v1295_v33 = vld [vmem:[#allocation8 + $0x60] ss:$8 sps:$4 sm:$0xff]   ;;  %v172_v5 = vsub.s32 0, %v1797_v4 }
  0xb0   :  { %667 = vmatprep.subr.bf16.mxu0 %v1281_v17  ;;  %v1296_v34 = vld [vmem:[#allocation8 + $0x74] ss:$8 sps:$4 sm:$0xff]   ;;  %v274_v35 = vsel %vm266_vm0, %v1274_v30, 0  ;;  %v1298_v36 = vld [vmem:[#allocation8 + $0x70] ss:$8 sps:$4 sm:$0xff]   ;;  %v1347_v54 = vld [vmem:[#allocation11 + $0x40] sm:$0xff]  }
  0xb1   :  { %v1299_v37 = vld [vmem:[#allocation8 + $0x84] ss:$8 sps:$4 sm:$0xff]   ;;  %v1301_v38 = vld [vmem:[#allocation8 + $0x80] ss:$8 sps:$4 sm:$0xff]   ;;  %v1302_v39 = vld [vmem:[#allocation8 + $0x94] ss:$8 sps:$4 sm:$0xff]  }
  0xb2   :  { %283 = vmatpush1.bf16.msra.mxu1 %v1266_v9  ;;  %v1304_v40 = vld [vmem:[#allocation8 + $0x90] ss:$8 sps:$4 sm:$0xff]   ;;  %v1305_v41 = vld [vmem:[#allocation8 + $0xa4] ss:$8 sps:$4 sm:$0xff]   ;;  %v1307_v42 = vld [vmem:[#allocation8 + $0xa0] ss:$8 sps:$4 sm:$0xff]  }
  0xb3   :  { %1082 = vmatprep.subr.msk.bf16.mxu1 %vm266_vm0, %v1267_v8  ;;  %668 = vmatpush1.bf16.msra.mxu0 %v1283_v21  ;;  %v1308_v43 = vld [vmem:[#allocation8 + $0xb4] ss:$8 sps:$4 sm:$0xff]   ;;  %v1310_v44 = vld [vmem:[#allocation8 + $0xb0] ss:$8 sps:$4 sm:$0xff]   ;;  %v1311_v45 = vld [vmem:[#allocation8 + $0xc4] ss:$8 sps:$4 sm:$0xff]  }
  0xb4   :  { %669 = vmatprep.subr.bf16.mxu0 %v1284_v22  ;;  %v1313_v46 = vld [vmem:[#allocation8 + $0xc0] ss:$8 sps:$4 sm:$0xff]   ;;  %v1314_v47 = vld [vmem:[#allocation8 + $0xd4] ss:$8 sps:$4 sm:$0xff]   ;;  %v1316_v48 = vld [vmem:[#allocation8 + $0xd0] ss:$8 sps:$4 sm:$0xff]  }
  0xb5   :  { %v1317_v49 = vld [vmem:[#allocation8 + $0xe4] ss:$8 sps:$4 sm:$0xff]   ;;  %v1319_v50 = vld [vmem:[#allocation8 + $0xe0] ss:$8 sps:$4 sm:$0xff]   ;;  %v1320_v51 = vld [vmem:[#allocation8 + $0xf4] ss:$8 sps:$4 sm:$0xff]  }
  0xb6   :  { %285 = vmatpush1.bf16.msra.mxu1 %v268_v15  ;;  %v1322_v52 = vld [vmem:[#allocation8 + $0xf0] ss:$8 sps:$4 sm:$0xff]   ;;  %v1325_v53 = vld [vmem:[#allocation8 + $0x104] ss:$8 sps:$4 sm:$0xff]   ;;  %v168_v6 = vld [vmem:[#allocation7] sm:$0x7] }
  0xb7   :  { %1196 = vmatprep.subr.bf16.mxu1 %v1623_v20  ;;  %670 = vmatpush1.bf16.msra.mxu0 %v1286_v24  ;;  %v1348_v55 = vld [vmem:[#allocation11] sm:$0xff]   ;;  %v1349_v56 = vld [vmem:[#allocation11 + $0x48] sm:$0xff]   ;;  %v1351_v58 = vld [vmem:[#allocation11 + $0x50] sm:$0xff]   ;;  %v176_v7 = vsub.s32 1, %v1797_v4  ;;  %v173_v8 = vrot.slane %v168_v6, %v172_v5  ;;  %v180_v30 = vsub.s32 2, %v1797_v4  ;;  %s1625_s8 = smov [#allocation17]  }
  0xb8   :  { %671 = vmatprep.subr.bf16.mxu0 %v1287_v25  ;;  %v1350_v57 = vld [vmem:[#allocation11 + $0x8] sm:$0xff]   ;;  %v1352_v59 = vld [vmem:[#allocation11 + $0x10] sm:$0xff]   ;;  %v1353_v60 = vld [vmem:[#allocation11 + $0x58] sm:$0xff]   ;;  %s1054_s26 = sshll.u32 %s1625_s8, 4  ;;  %s1055_s26 = int_to_ptr.vmem [resolvable:$true] %s1054_s26 }
  0xb9   :  { %1083 = vmatmul.mubr.msk.bf16.vlgmr.msra.gmra.mrb[0].mxu1 %vm262_vm1, %v147_v18  ;;  %v1354_v61 = vld [vmem:[#allocation11 + $0x18] sm:$0xff]   ;;  %v1355_v62 = vld [vmem:[#allocation11 + $0x60] sm:$0xff]   ;;  %v1357_v1 = vld [vmem:[#allocation11 + $0x68] sm:$0xff]   ;;  %v177_v9 = vrot.slane %v168_v6, %v176_v7  ;;  %s1573_s2 = scalar_lea.vmem %s1055_s26, 128  ;;  %p1578_p3 = scmp.lt.s32.totalorder %s1055_s26, %s1055_s26 }
  0xba   :  { %1197 = vmatpush3.bf16.msra.mxu1 %v1270_v19  ;;  %1206 = vmatprep.mubr.msk.bf16.mxu1 %vm1624_vm2, %v1623_v20  ;;  %v1356_v63 = vld [vmem:[#allocation11 + $0x20] sm:$0xff]   ;;  %v1358_v2 = vld [vmem:[#allocation11 + $0x28] sm:$0xff]   ;;  %v1328_v22 = vld [vmem:[#allocation8 + $0x114] ss:$8 sps:$4 sm:$0xff]   ;;  %p1574_p2 = scmp.ne.s32.totalorder %s1055_s26, %s1573_s2  ;;  %p1579_p4 = scmp.lt.s32.totalorder %s1573_s2, %s1573_s2 }
  0xbb   :  { %1198 = vmatprep.subr.bf16.mxu1 %v1623_v20  ;;  %672 = vmatpush1.bf16.msra.mxu0 %v1289_v27  ;;  %v1323_v19 = vld [vmem:[#allocation8 + $0x100] ss:$8 sps:$4 sm:$0xff]   ;;  %v1331_v24 = vld [vmem:[#allocation8 + $0x124] ss:$8 sps:$4 sm:$0xff]   ;;  %v1332_v27 = vld [vmem:[#allocation8 + $0x130] ss:$8 sps:$4 sm:$0xff]  }
  0xbc   :  { %673 = vmatprep.subr.bf16.mxu0 %v1290_v29  ;;  %v1329_v25 = vld [vmem:[#allocation8 + $0x120] ss:$8 sps:$4 sm:$0xff]   ;;  %v1368_v3 = vld [vmem:[#allocation14 + $0x28] sm:$0xff]   ;;  %v1369_v4 = vld [vmem:[#allocation14 + $0x30] sm:$0xff]   ;;  %p1580_p5 = por %p1579_p4, %p1578_p3 }
  0xbe   :  { %1199 = vmatpush3.bf16.msra.mxu1 %v1271_v23  ;;  %v1326_v23 = vld [vmem:[#allocation8 + $0x110] ss:$8 sps:$4 sm:$0xff]   ;;  %p1581_p6 = pnand %p1580_p5, %p1574_p2 }
  0xbf   :  { %1200 = vmatprep.subr.bf16.mxu1 %v1623_v20  ;;  %674 = vmatpush1.bf16.msra.mxu0 %v1292_v31 }
  0xc0   :  { %675 = vmatprep.subr.bf16.mxu0 %v1293_v32  ;;  %v1335_v32 = vld [vmem:[#allocation8 + $0x140] ss:$8 sps:$4 sm:$0xff]  }
  0xc2   :  { %1201 = vmatpush3.bf16.msra.mxu1 %v1272_v26  ;;  %v1334_v26 = vld [vmem:[#allocation8 + $0x134] ss:$8 sps:$4 sm:$0xff]  }
  0xc3   :  { %1202 = vmatprep.subr.bf16.mxu1 %v1623_v20  ;;  %676 = vmatpush1.bf16.msra.mxu0 %v1295_v33 }
  0xc4   :  { %677 = vmatprep.subr.bf16.mxu0 %v1296_v34  ;;  %v1340_v34 = vld [vmem:[#allocation8 + $0x154] ss:$8 sps:$4 sm:$0xff]  }
  0xc6   :  { %1203 = vmatpush3.bf16.msra.mxu1 %v1273_v28  ;;  %v1337_v28 = vld [vmem:[#allocation8 + $0x144] ss:$8 sps:$4 sm:$0xff]  }
  0xc7   :  { %1204 = vmatprep.subr.bf16.mxu1 %v1623_v20  ;;  %678 = vmatpush1.bf16.msra.mxu0 %v1298_v36  ;;  %v1338_v36 = vld [vmem:[#allocation8 + $0x150] ss:$8 sps:$4 sm:$0xff]  }
  0xc8   :  { %679 = vmatprep.subr.bf16.mxu0 %v1299_v37  ;;  %v1343_v37 = vld [vmem:[#allocation8 + $0x164] ss:$8 sps:$4 sm:$0xff]  }
  0xca   :  { %1205 = vmatpush3.bf16.msra.mxu1 %v274_v35  ;;  %v181_v35 = vrot.slane %v168_v6, %v180_v30 }
  0xcb   :  { %680 = vmatpush1.bf16.msra.mxu0 %v1301_v38  ;;  %1165 = vmatprep.subr.bf16.mxu1 %v1347_v54 }
  0xcc   :  { %681 = vmatprep.subr.bf16.mxu0 %v1302_v39  ;;  %v1341_v39 = vld [vmem:[#allocation8 + $0x160] ss:$8 sps:$4 sm:$0xff]  }
  0xcd   :  { %1207 = vmatmul.mubr.msk.bf16.vlgmr.msra.gmra.mrb[4].mxu1 %vm262_vm1, %v147_v18 }
  0xce   :  { %1166 = vmatpush3.bf16.msra.mxu1 %v1348_v55 }
  0xcf   :  { %682 = vmatpush1.bf16.msra.mxu0 %v1304_v40  ;;  %1167 = vmatprep.subr.bf16.mxu1 %v1349_v56  ;;  %v1346_v40 = vld [vmem:[#allocation8 + $0x174] ss:$8 sps:$4 sm:$0xff]  }
  0xd0   :  { %683 = vmatprep.subr.bf16.mxu0 %v1305_v41 }
  0xd2   :  { %1168 = vmatpush3.bf16.msra.mxu1 %v1350_v57 }
  0xd3   :  { %684 = vmatpush1.bf16.msra.mxu0 %v1307_v42  ;;  %1169 = vmatprep.subr.bf16.mxu1 %v1351_v58  ;;  %v1344_v42 = vld [vmem:[#allocation8 + $0x170] ss:$8 sps:$4 sm:$0xff]  }
  0xd4   :  { %685 = vmatprep.subr.bf16.mxu0 %v1308_v43 }
  0xd6   :  { %1170 = vmatpush3.bf16.msra.mxu1 %v1352_v59 }
  0xd7   :  { %686 = vmatpush1.bf16.msra.mxu0 %v1310_v44  ;;  %1171 = vmatprep.subr.bf16.mxu1 %v1353_v60  ;;  %v1359_v44 = vld [vmem:[#allocation11 + $0x70] sm:$0xff]   ;;  %v1363_v60 = vld [vmem:[#allocation14] sm:$0xff]  }
  0xd8   :  { %687 = vmatprep.subr.bf16.mxu0 %v1311_v45  ;;  %v1360_v45 = vld [vmem:[#allocation11 + $0x30] sm:$0xff]  }
  0xda   :  { %1172 = vmatpush3.bf16.msra.mxu1 %v1354_v61 }
  0xdb   :  { %688 = vmatpush1.bf16.msra.mxu0 %v1313_v46  ;;  %1173 = vmatprep.subr.bf16.mxu1 %v1355_v62  ;;  %v1361_v46 = vld [vmem:[#allocation11 + $0x78] sm:$0xff]   ;;  %v1364_v62 = vld [vmem:[#allocation14 + $0x8] sm:$0xff]  }
  0xdc   :  { %689 = vmatprep.subr.bf16.mxu0 %v1314_v47  ;;  %v1362_v47 = vld [vmem:[#allocation11 + $0x38] sm:$0xff]  }
  0xde   :  { %1174 = vmatpush3.bf16.msra.mxu1 %v1356_v63  ;;  %v1365_v63 = vld [vmem:[#allocation14 + $0x10] sm:$0xff]  }
  0xdf   :  { %690 = vmatpush1.bf16.msra.mxu0 %v1316_v48  ;;  %1175 = vmatprep.subr.bf16.mxu1 %v1357_v1  ;;  %v411_v48 = vld [vmem:[#allocation10] sm:$0x3] }
  0xe0   :  { %691 = vmatprep.subr.bf16.mxu0 %v1317_v49  ;;  %v416_v49 = vrot.slane %v411_v48, %v172_v5  ;;  %v1366_v1 = vld [vmem:[#allocation14 + $0x18] sm:$0xff]  }
  0xe1   :  { %v1370_v5 = vld [vmem:[#allocation14 + $0x38] sm:$0xff]  }
  0xe2   :  { %1176 = vmatpush3.bf16.msra.mxu1 %v1358_v2  ;;  %v1367_v2 = vld [vmem:[#allocation14 + $0x20] sm:$0xff]  }
  0xe3   :  { %692 = vmatpush1.bf16.msra.mxu0 %v1319_v50  ;;  %1177 = vmatprep.subr.bf16.mxu1 %v1359_v44  ;;  %v420_v50 = vrot.slane %v411_v48, %v176_v7  ;;  %v1133_v7 = vld [vmem:[#allocation13] ss:$0 sm:$0xff] }
  0xe4   :  { %693 = vmatprep.subr.bf16.mxu0 %v1320_v51 }
  0xe6   :  { %1178 = vmatpush3.bf16.msra.mxu1 %v1360_v45 }
  0xe7   :  { %694 = vmatpush1.bf16.msra.mxu0 %v1322_v52  ;;  %1179 = vmatprep.subr.bf16.mxu1 %v1361_v46 }
  0xe8   :  { %704 = vmatprep.subr.bf16.mxu0 %v1325_v53 }
  0xea   :  { %1180 = vmatpush3.bf16.msra.mxu1 %v1362_v47 }
  0xeb   :  { %1210 = vmatprep.subr.bf16.mxu1 %v1623_v20 }
 0x18c   :  { %v310_v10 = vpop.f32.mrb[0].mxu1 }
 0x18d   :  { %v311_v11 = vadd.f32 %v310_v10, %v173_v8  ;;  %v312_v12 = vpop.f32.mrb[1].mxu1 }
 0x18e   :  { %v313_v13 = vadd.f32 %v312_v12, %v177_v9  ;;  %v314_v14 = vpop.f32.mrb[2].mxu1 }
 0x18f   :  { %v357_v15 = vmax.f32 %v311_v11, 0.0  ;;  %v315_v16 = vpop.f32.mrb[3].mxu1 }
 0x190   :  { %v358_v17 = vmax.f32 %v313_v13, 0.0 }
 0x191   :  { %v360_v21 = vpack.c.bf16 %v357_v15, %v357_v15  ;;  %v1150_v15 = vld [vmem:[#allocation16] ss:$0 sm:$0xff] }
 0x192   :  { %v361_v18 = vpack.c.bf16 %v358_v17, %v358_v17 }
 0x194   :  { %695 = vmatprep.mubr.bf16.mxu0 %v361_v18 }
 0x195   :  { %696 = vmatmul.mubr.bf16.vlgmr.msra.gmra.mrb[0].mxu0 %v360_v21 }
 0x196   :  { %705 = vmatpush1.bf16.msra.mxu0 %v1323_v19  ;;  %736 = vmatprep.mubr.bf16.mxu0 %v1622_v0 }
 0x197   :  { %706 = vmatprep.subr.bf16.mxu0 %v1328_v22 }
 0x19a   :  { %707 = vmatpush1.bf16.msra.mxu0 %v1326_v23 }
 0x19b   :  { %708 = vmatprep.subr.bf16.mxu0 %v1331_v24 }
 0x19e   :  { %709 = vmatpush1.bf16.msra.mxu0 %v1329_v25 }
 0x19f   :  { %710 = vmatprep.subr.bf16.mxu0 %v1334_v26 }
 0x1a0   :  { %v351_v29 = vpop.f32.mrb[4].mxu1 }
 0x1a1   :  { %v1208_v31 = vpop.f32.mrb[5].mxu1  ;;  %v352_v38 = vadd.f32 %v351_v29, %v181_v35 }
 0x1a2   :  { %711 = vmatpush1.bf16.msra.mxu0 %v1332_v27  ;;  %v354_v33 = vpop.f32.mrb[6].mxu1 }
 0x1a3   :  { %712 = vmatprep.subr.bf16.mxu0 %v1337_v28  ;;  %v1209_v0 = vpop.f32.mrb[7].mxu1  ;;  %v359_v41 = vmax.f32 %v352_v38, 0.0 }
 0x1a5   :  { %v362_v43 = vpack.c.bf16 %v359_v41, %v359_v41 }
 0x1a6   :  { %713 = vmatpush1.bf16.msra.mxu0 %v1335_v32 }
 0x1a7   :  { %714 = vmatprep.subr.bf16.mxu0 %v1340_v34 }
 0x1aa   :  { %715 = vmatpush1.bf16.msra.mxu0 %v1338_v36 }
 0x1ab   :  { %716 = vmatprep.subr.bf16.mxu0 %v1343_v37 }
 0x1ae   :  { %717 = vmatpush1.bf16.msra.mxu0 %v1341_v39 }
 0x1af   :  { %718 = vmatprep.subr.bf16.mxu0 %v1346_v40 }
 0x1b2   :  { %719 = vmatpush1.bf16.msra.mxu0 %v1344_v42 }
 0x1b5   :  { %737 = vmatmul.mubr.bf16.vlgmr.msra.gmra.mrb[0].mxu0 %v362_v43 }
 0x288   :  { %v738_v51 = vpop.f32.mrb[0].mxu0 }
 0x289   :  { %v1230_v52 = vadd.f32 %v738_v51, %v416_v49  ;;  %v740_v53 = vpop.f32.mrb[1].mxu0 }
 0x28a   :  { %v1231_v54 = vadd.f32 %v740_v53, %v420_v50  ;;  %v742_v55 = vpop.f32.mrb[2].mxu0 }
 0x28b   :  { %v745_v56 = vmax.f32 %v1230_v52, 0.0  ;;  %v743_v57 = vpop.f32.mrb[3].mxu0 }
 0x28c   :  { %v746_v58 = vmax.f32 %v1231_v54, 0.0 }
 0x28d   :  { %v747_v61 = vpack.c.bf16 %v745_v56, %v745_v56 }
 0x28e   :  { %v748_v59 = vpack.c.bf16 %v746_v58, %v746_v58 }
 0x290   :  { %916 = vmatprep.mubr.bf16.mxu1 %v748_v59 }
 0x291   :  { %917 = vmatmul.mubr.bf16.vlgmr.msra.gmra.mrb[8].mxu1 %v747_v61 }
 0x292   :  { %1211 = vmatpush3.bf16.msra.mxu1 %v1363_v60  ;;  %1226 = vmatprep.mubr.msk.bf16.mxu1 %vm1624_vm2, %v1623_v20 }
 0x293   :  { %1212 = vmatprep.subr.bf16.mxu1 %v1623_v20 }
 0x296   :  { %1213 = vmatpush3.bf16.msra.mxu1 %v1364_v62 }
 0x297   :  { %1214 = vmatprep.subr.bf16.mxu1 %v1623_v20 }
 0x29a   :  { %1215 = vmatpush3.bf16.msra.mxu1 %v1365_v63 }
 0x29b   :  { %1216 = vmatprep.subr.bf16.mxu1 %v1623_v20 }
 0x29e   :  { %1217 = vmatpush3.bf16.msra.mxu1 %v1366_v1 }
 0x29f   :  { %1218 = vmatprep.subr.bf16.mxu1 %v1623_v20 }
 0x2a2   :  { %1219 = vmatpush3.bf16.msra.mxu1 %v1367_v2 }
 0x2a3   :  { %1220 = vmatprep.subr.bf16.mxu1 %v1623_v20 }
 0x2a6   :  { %1221 = vmatpush3.bf16.msra.mxu1 %v1368_v3 }
 0x2a7   :  { %1222 = vmatprep.subr.bf16.mxu1 %v1623_v20 }
 0x2aa   :  { %1223 = vmatpush3.bf16.msra.mxu1 %v1369_v4 }
 0x2ab   :  { %1224 = vmatprep.subr.bf16.mxu1 %v1623_v20 }
 0x2ae   :  { %1225 = vmatpush3.bf16.msra.mxu1 %v1370_v5 }
 0x364   :  { %v1181_v6 = vpop.f32.mrb[8].mxu1 }
 0x365   :  { %v1182_v8 = vpop.f32.mrb[9].mxu1 }
 0x366   :  { %v1183_v9 = vadd.f32 %v1182_v8, %v1181_v6  ;;  %v1184_v10 = vpop.f32.mrb[10].mxu1 }
 0x367   :  { %v1185_v11 = vpop.f32.mrb[11].mxu1 }
 0x368   :  { %v919_v12 = vadd.f32 %v1183_v9, %v1133_v7 }
 0x36a   :  { %v924_v13 = vmax.f32 %v919_v12, 0.0 }
 0x36c   :  { %v925_v14 = vpack.c.bf16 %v924_v13, %v924_v13 }
 0x36e   :  { %1227 = vmatmul.mubr.bf16.vlgmr.msra.gmra.mrb[12].mxu1 %v925_v14 }
 0x441   :  { %v1031_v16 = vpop.f32.mrb[12].mxu1 }
 0x442   :  { %v1032_v17 = vadd.f32 %v1150_v15, %v1031_v16  ;;  %v1228_v18 = vpop.f32.mrb[13].mxu1 }
 0x443   :  { %v1034_v19 = vpop.f32.mrb[14].mxu1 }
 0x444   :  { %1037 = vmax.xlane.f32.xlu0 %v1032_v17  ;;  %v1229_v21 = vpop.f32.mrb[15].mxu1 }
 0x4d1   :  { %v1038_v20 = vpop.xlane.xlu0 %1037 }
 0x4d2   :  { %v1039_v22 = vsub.f32 %v1032_v17, %v1038_v20 }
 0x4d4   :  { %v1040_v23 = vmul.f32 1.442695, %v1039_v22 }
 0x4d6   :  { %1371 = vpow2.f32 %v1040_v23 }
 0x4e0   :  { %v1372_v24 = vpop.eup %1371 }
 0x4e1   :  { %1042 = vadd.xlane.f32.xlu0 %v1372_v24 }
 0x56e   :  { %v1043_v25 = vpop.xlane.xlu0 %1042 }
 0x56f   :  { %1373 = vlog2.f32 %v1043_v25 }
 0x579   :  { %v1374_v26 = vpop.eup %1373 }
 0x57a   :  { %v1045_v27 = vmul.f32 0.6931472, %v1374_v26 }
 0x57c   :  { %v1046_v28 = vsub.f32 %v1039_v22, %v1045_v27 }
 0x57e   :  { %1047 = vst [vmem:[#allocation17] sm:$0xff] %v1046_v28 }
 0x57f   :  { %1584 = shalt.err (!%p1581_p6)
}
 0x580   :  { %s1585_s3 = scalar_lea.hbm %s1842_s9, 128 }
 0x581   :  { %p1586_p7 = scmp.ne.s32.totalorder %s1842_s9, %s1585_s3  ;;  %p1589_p8 = scmp.lt.u32.totalorder %s1585_s3, %s1842_s9 }
 0x583   :  { %p1591_p9 = pnand %p1589_p8, %p1586_p7 }
 0x585   :  { %1594 = shalt.err (!%p1591_p9)
}
 0x586   :  { %1057 = dma.vmem_to_hbm [thread:$0]  %s1055_s26, 128, %s1842_s9, [#allocation4]  }
 0x587   :  { %1605 = dma.done.wait [#allocation4], 128  }
 0x588   :  { %1606 = vsyncadd [#allocation4], 4294967168 }
 0x589   :  { %1061 = vsyncpa [#allocation3], 1 }
 0x58a   :  { %1062 = vsyncpa [#allocation6], 1 }
 0x58b   :  { %1063 = vsyncpa [#allocation9], 1 }
 0x58c   :  { %1064 = vsyncpa [#allocation12], 1 }
 0x58d   :  { %1065 = vsyncpa [#allocation15], 1 }
 0x58e   :  { %1066 = vsyncpa [#allocation4], 1 }

</bundles_post_ra>
